<compile_context>
chip_gen: v5e
topology: v5e:2x2
jax: 0.10.0
libtpu: 0.0.40
codegen_flags: <defaults>
</compile_context>

<pallas_src>
import jax
import jax.numpy as jnp
from jax.experimental import pallas as pl
from jax.experimental.pallas import tpu as pltpu


_SCALE = 0.1
_VMEM_TILE_BUDGET_BYTES = 2 * 1024 * 1024   # per x tile; ~6x of this lives in VMEM
_MIN_PIPELINE_STEPS = 8
_VMEM_LIMIT_BYTES = 32 * 1024 * 1024        # safe on v5e/v6e/v7x


def _pe_add_kernel(x_ref, pe_ref, o_ref):
    # out = x + 0.1 * pe   (pe broadcasts over the leading batch-block dim of x)
    o_ref[...] = x_ref[...] + pe_ref[...] * _SCALE


def make_positional_encoding(max_length: int, embedding_dim: int,
                             dtype=jnp.float32) -> jnp.ndarray:
    """Builds the registered `pe` buffer, shape (max_length, embedding_dim)."""
    e_idx = jnp.arange(embedding_dim, dtype=jnp.float32)
    pos = jnp.arange(max_length, dtype=jnp.float32)[:, None]        # (L, 1)
    freq_term = 10000.0 ** (2.0 * e_idx / float(embedding_dim))     # (E,)
    angles = pos / freq_term                                        # (L, E)
    even = (jnp.arange(embedding_dim) % 2) == 0
    pe = jnp.where(even[None, :], jnp.sin(angles), jnp.cos(angles))
    return pe.astype(dtype)


def _choose_tiling(batch: int, per_batch_elems: int, itemsize: int):
    """Pick (lane, rows_per_batch, tile_rows) for the lane-dense layout, or None."""
    lane = None
    for cand in (1024, 512, 256, 128):
        if per_batch_elems % cand == 0:
            lane = cand
            break
    if lane is None:
        return None
    rows_per_batch = per_batch_elems // lane
    max_rows_by_vmem = max(1, _VMEM_TILE_BUDGET_BYTES // (lane * itemsize))
    # Divisors of rows_per_batch that are multiples of 8 (clean sublane tiles).
    candidates = [d for d in range(8, rows_per_batch + 1, 8)
                  if rows_per_batch % d == 0 and d <= max_rows_by_vmem]
    if not candidates:
        # Small / awkward row count: take the whole per-batch slab (full dim is
        # always a legal block shape).
        return lane, rows_per_batch, rows_per_batch
    # Prefer the largest tile that still leaves enough grid steps to pipeline.
    enough_steps = [d for d in candidates
                    if batch * (rows_per_batch // d) >= _MIN_PIPELINE_STEPS]
    tile_rows = max(enough_steps) if enough_steps else max(candidates)
    return lane, rows_per_batch, tile_rows


def positional_encoding_forward(x: jnp.ndarray, pe: jnp.ndarray) -> jnp.ndarray:
    """x: (B, L, E); pe: (max_length, E) buffer.  Returns x + 0.1 * pe[:L]."""
    B, L, E = x.shape
    pe = pe[:L].astype(x.dtype)                      # static slice of the buffer
    itemsize = jnp.dtype(x.dtype).itemsize

    compiler_params = pltpu.CompilerParams(
        dimension_semantics=("parallel", "parallel"),
        vmem_limit_bytes=_VMEM_LIMIT_BYTES,
    )

    tiling = _choose_tiling(B, L * E, itemsize)
    if tiling is None:
        # Fallback for shapes where L*E is not a multiple of 128: one batch row
        # per grid step, whole (L, E) block (correct, but masked lane stores).
        return pl.pallas_call(
            _pe_add_kernel,
            out_shape=jax.ShapeDtypeStruct((B, L, E), x.dtype),
            grid=(B,),
            in_specs=[
                pl.BlockSpec((1, L, E), lambda b: (b, 0, 0)),
                pl.BlockSpec((L, E), lambda b: (0, 0)),
            ],
            out_specs=pl.BlockSpec((1, L, E), lambda b: (b, 0, 0)),
            input_output_aliases={0: 0},
            compiler_params=pltpu.CompilerParams(
                dimension_semantics=("parallel",),
                vmem_limit_bytes=_VMEM_LIMIT_BYTES,
            ),
        )(x, pe)

    lane, rows_per_batch, tile_rows = tiling
    n_row_blocks = rows_per_batch // tile_rows

    # Pure row-major reshapes (no data movement): the flattened add is
    # elementwise-identical to the (B, L, E) add with pe broadcast over batch.
    x_flat = x.reshape(B, rows_per_batch, lane)
    pe_flat = pe.reshape(rows_per_batch, lane)

    out_flat = pl.pallas_call(
        _pe_add_kernel,
        out_shape=jax.ShapeDtypeStruct((B, rows_per_batch, lane), x.dtype),
        grid=(n_row_blocks, B),                  # batch innermost: pe tile resident
        in_specs=[
            pl.BlockSpec((1, tile_rows, lane), lambda r, b: (b, r, 0)),   # x
            pl.BlockSpec((tile_rows, lane), lambda r, b: (r, 0)),          # pe
        ],
        out_specs=pl.BlockSpec((1, tile_rows, lane), lambda r, b: (b, r, 0)),
        input_output_aliases={0: 0},             # in-place x += 0.1 * pe
        compiler_params=compiler_params,
    )(x_flat, pe_flat)
    return out_flat.reshape(B, L, E)


if __name__ == "__main__":
    # Small shapes consistent with the module: B=2, L=8 (<= max_length), E=32.
    B, L, E = 2, 8, 32
    MAX_LEN = 16

    key = jax.random.PRNGKey(0)
    x = jax.random.normal(key, (B, L, E), dtype=jnp.float32)

    pe = make_positional_encoding(MAX_LEN, E, dtype=x.dtype)

    # Pure-JAX reference, written exactly like the PyTorch buffer construction
    # (0::2 -> sin, 1::2 -> cos, raw-channel-index freq term).  Computed BEFORE
    # the kernel call so the in-place aliasing cannot disturb the check.
    e_idx = jnp.arange(E, dtype=jnp.float32)
    pos = jnp.arange(MAX_LEN, dtype=jnp.float32)[:, None]
    freq = 10000.0 ** (2.0 * e_idx / float(E))
    pe_ref = jnp.zeros((MAX_LEN, E), jnp.float32)
    pe_ref = pe_ref.at[:, 0::2].set(jnp.sin(pos / freq[0::2]))
    pe_ref = pe_ref.at[:, 1::2].set(jnp.cos(pos / freq[1::2]))
    ref = jax.block_until_ready(x + 0.1 * pe_ref[None, :L, :])

    out = jax.block_until_ready(positional_encoding_forward(x, pe))

    assert out.shape == (B, L, E)
    assert jnp.allclose(out, ref, atol=1e-6, rtol=1e-6)

    print("KERNEL_OK")
</pallas_src>

<mosaic_0001>
module attributes {stable_mosaic.version = 11 : i64} {
  func.func @_pe_add_kernel(%arg0: i32, %arg1: i32, %arg2: memref<1x1x256xf32, #tpu.memory_space<vmem>>, %arg3: memref<1x256xf32, #tpu.memory_space<vmem>>, %arg4: memref<1x1x256xf32, #tpu.memory_space<vmem>>) attributes {dimension_semantics = [#tpu.dimension_semantics<parallel>, #tpu.dimension_semantics<parallel>], iteration_bounds = array<i64: 1, 2>, scalar_prefetch = 0 : i64, scratch_operands = 0 : i64, tpu.core_type = #tpu.core_type<tc>, window_params = [{transform_indices = @transform_0, window_bounds = array<i64: 1, 1, 256>}, {transform_indices = @transform_1, window_bounds = array<i64: 1, 256>}, {transform_indices = @transform_2, window_bounds = array<i64: 1, 1, 256>}]} {
    %c0 = arith.constant 0 : index
    %c0_0 = arith.constant 0 : index
    %c0_1 = arith.constant 0 : index
    %0 = vector.load %arg2[%c0, %c0_0, %c0_1] : memref<1x1x256xf32, #tpu.memory_space<vmem>>, vector<1x1x256xf32>
    %c0_2 = arith.constant 0 : index
    %c0_3 = arith.constant 0 : index
    %1 = vector.load %arg3[%c0_2, %c0_3] : memref<1x256xf32, #tpu.memory_space<vmem>>, vector<1x256xf32>
    %cst = arith.constant 1.000000e-01 : f32
    %2 = vector.broadcast %cst : f32 to vector<1x256xf32>
    %3 = arith.mulf %1, %2 : vector<1x256xf32>
    %4 = vector.shape_cast %3 : vector<1x256xf32> to vector<1x1x256xf32>
    %5 = arith.addf %0, %4 : vector<1x1x256xf32>
    %c0_4 = arith.constant 0 : index
    %c0_5 = arith.constant 0 : index
    %c0_6 = arith.constant 0 : index
    %6 = vector.load %arg4[%c0_4, %c0_5, %c0_6] : memref<1x1x256xf32, #tpu.memory_space<vmem>>, vector<1x1x256xf32>
    tpu.vector_store %arg4[%c0_4, %c0_5, %c0_6], %5 {strides = array<i32>} : memref<1x1x256xf32, #tpu.memory_space<vmem>>, vector<1x1x256xf32>,
    return
  }
  func.func @transform_0(%arg0: i32, %arg1: i32) -> (i32, i32, i32) {
    %c0_i32 = arith.constant 0 : i32
    %c0_i32_0 = arith.constant 0 : i32
    return %arg1, %arg0, %c0_i32 : i32, i32, i32
  }
  func.func @transform_1(%arg0: i32, %arg1: i32) -> (i32, i32) {
    %c0_i32 = arith.constant 0 : i32
    %c0_i32_0 = arith.constant 0 : i32
    return %arg0, %c0_i32 : i32, i32
  }
  func.func @transform_2(%arg0: i32, %arg1: i32) -> (i32, i32, i32) {
    %c0_i32 = arith.constant 0 : i32
    %c0_i32_0 = arith.constant 0 : i32
    return %arg1, %arg0, %c0_i32 : i32, i32, i32
  }
}

</mosaic_0001>

<bundles_post_ra>
// kernel: tpu_custom_call.1
= control target key start
LH: loop header
LB: loop body
LE: loop exit
PB: predicated region body
PF: predicated region fallthrough
CT: control target
= control target key end

     0   :  { %7 = vsyncpa [#allocation3], 0  ;;  %s648_s0 = inlined_call_operand.hbm [shape: f32[2,1,256], index: 0, kind: input, shape index: {}, may-alias: {0,2}]   ;;  %s649_s1 = inlined_call_operand.vmem [shape: f32[1,256], index: 1, kind: input, shape index: {}]   ;;  %s650_s2 = inlined_call_operand.hbm [shape: f32[2,1,256], index: 2, kind: output, shape index: {}, may-alias: {0,2}]  }
   0x1   :  { %9 = vsyncpa [#allocation3 + $0x1], 0 }
   0x2   :  { %10 = vsyncpa [#allocation4], 0 }
   0x3   :  { %12 = vsyncpa [#allocation4 + $0x1], 0  ;;  %s525_s9 = smov 0   ;;  %s527_s10 = smov 0  }
   0x4   :  { %s529_s11 = smov 0   ;;  %s531_s12 = smov 0  }
   0x5   :  { %s533_s13 = smov 0   ;;  %s535_s14 = smov 0  }
   0x6 LB: > { %s320_s15 = sadd.s32 4294967295, %s508_s14   ;;  %s321_s16 = sadd.s32 4294967294, %s508_s14   ;;  %s508_s14 = sphi %s535_s14, %s18_s14   ;;  %s504_s13 = sphi %s533_s13, %s659_s13   ;;  %s500_s12 = sphi %s531_s12, %s658_s12   ;;  %s496_s11 = sphi %s529_s11, %s657_s11   ;;  %s492_s10 = sphi %s527_s10, %s656_s10   ;;  %s488_s9 = sphi %s525_s9, %s655_s9  }
   0x7   : > { %s27_s17 = sadd.s32 1, %s504_s13  ;;  %s39_s18 = sadd.s32 1, %s496_s11 }
   0x8   : > { %p28_p0 = scmp.ge.s32.totalorder %s27_s17, 2  ;;  %p46_p1 = scmp.ne.s32.totalorder %s496_s11, %s492_s10 }
   0x9   : > { %p47_p2 = scmp.eq.s32.totalorder %s508_s14, 0  ;;  %p52_p3 = scmp.ne.s32.totalorder %s492_s10, %s488_s9 }
   0xa   : > { %s661_s17 = smov (%p28_p0, %s27_s17), 0  ;;  %p53_p5 = scmp.eq.s32.totalorder %s320_s15, 0 }
   0xb   : > { %p566_p4 = por %p47_p2, %p46_p1  ;;  %s34_s20 = ssub.s32 %s504_s13, %s661_s17 }
   0xc   : > { %p104_p6 = scmp.eq.s32.totalorder %s320_s15, 1  ;;  %p37_p7 = scmp.eq.s32.totalorder %s34_s20, 0 }
   0xd   : > { %p572_p8 = por %p53_p5, %p52_p3  ;;  %p110_p10 = scmp.eq.s32.totalorder %s321_s16, 1 }
   0xe   : > { %p576_p9 = por %p104_p6, %p46_p1  ;;  %p324_p12 = scmp.ge.s32.totalorder %s508_s14, 2 }
   0xf   : > { %s581_s23 = scalar_select %p37_p7, %s496_s11, %s39_s18  }
  0x10   : > { %p583_p11 = por %p110_p10, %p52_p3  ;;  %p346_p13 = scmp.lt.s32.totalorder %s508_s14, 2 }
  0x11   : > { %s137_s25 = sand.u32 1, %s496_s11   ;;  %s326_s27 = sshll.u32 %s504_s13, 1 }
  0x12   : > { %s325_s26 = sshll.u32 %s137_s25, 1  ;;  %s147_s30 = scalar_lea.hbm %s648_s0, %s326_s27 }
  0x13   : > { %s141_s3 = scalar_lea.vmem [#allocation2], %s325_s26  ;;  %s149_s5 = sshll.u32 %s147_s30, 4  ;;  %s150_s5 = int_to_ptr.hbm [resolvable:$true] %s149_s5 }
  0x14   : > { %s151_s4 = sshll.u32 %s141_s3, 4  ;;  %p339_p0 = pnand %p346_p13, %p566_p4  ;;  %s152_s4 = int_to_ptr.vmem [resolvable:$true] %s151_s4 }
  0x15   : > { %p327_p1 = scmp.ge.s32.totalorder %s508_s14, 1  ;;  %p156_p2 = scmp.lt.s32.totalorder %s508_s14, 3 }
  0x16   : > { %s138_s6 = scalar_lea.sflag [#allocation3], %s137_s25 }
  0x17   : > { %341 = dma.hbm_to_vmem [thread:$0]  (!%p339_p0), %s150_s5, 32, %s152_s4, %s138_s6  }
  0x18   : > { %p157_p3 = pnand %p327_p1, %p156_p2 }
  0x19   : > { %s599_s7 = sand.u32 (!%p157_p3), 1, %s492_s10  }
  0x1a   : > { %160 = sbr.rel (%p157_p3) target bundleno = 47 (0x2f), region = 28  ;;  %s328_s8 = sshll.u32 (!%p157_p3), %s599_s7, 1 }
  0x1b   : > { %s163_s15 = scalar_lea.sflag (!%p157_p3), [#allocation3], %s599_s7  ;;  %s166_s16 = scalar_lea.vmem (!%p157_p3), [#allocation2], %s328_s8 }
  0x1f   : > { %479 = dma.done.wait (%p572_p8), %s163_s15, 32  }
  0x20   : > { %481 = vsyncadd (%p572_p8), %s163_s15, 4294967264  ;;  %s331_s18 = sshll.u32 %s500_s12, 1  ;;  %v200_v0 = vlaneseq  ;;  %v196_v1 = vld [vmem:[%s166_s16] sm:$0x3]  ;;  %s191_s28 = scalar_lea.vmem [#allocation5], %s328_s8 }
  0x21   : > { %s218_s25 = scalar_lea.hbm %s650_s2, %s331_s18  ;;  %v197_v2 = vld [vmem:[%s649_s1] sm:$0x3]  ;;  %s220_s29 = sshll.u32 %s191_s28, 4  ;;  %s221_s29 = int_to_ptr.vmem [resolvable:$true] %s220_s29 }
  0x22   : > { %s222_s30 = sshll.u32 %s218_s25, 4  ;;  %v198_v3 = vmul.f32 0.1, %v197_v2  ;;  %vm202_vm0 = vcmp.lt.s32.totalorder %v200_v0, 256  ;;  %s206_s12 = scalar_lea.sflag [#allocation4], %s599_s7  ;;  %s223_s30 = int_to_ptr.hbm [resolvable:$true] %s222_s30 }
  0x23   : > { %s440_s21 = sshra.s32 %s223_s30, 4  ;;  %s446_s6 = scalar_lea.hbm %s650_s2, 4  ;;  %s441_s21 = int_to_ptr.hbm [resolvable:$true] %s440_s21 }
  0x24   : > { %v199_v4 = vadd.f32 %v198_v3, %v196_v1  ;;  %s442_s3 = scalar_lea.hbm %s441_s21, 2  ;;  %p447_p7 = scmp.lt.s32.totalorder %s441_s21, %s650_s2 }
  0x25   : > { %p443_p4 = scmp.ne.s32.totalorder %s441_s21, %s442_s3  ;;  %p448_p8 = scmp.lt.s32.totalorder %s446_s6, %s442_s3 }
  0x26   : > { %204 = vst.msk [vmem:[%s191_s28] sm:$0x3] %vm202_vm0, %v199_v4 }
  0x27   : > { %p444_p5 = pnand %p443_p4, %p576_p9  ;;  %p449_p10 = por %p448_p8, %p447_p7 }
  0x29   : > { %p445_p6 = pneg %p444_p5 }
  0x2b   : > { %p450_p13 = pnand %p449_p10, %p445_p6 }
  0x2d   : > { %453 = shalt.err (!%p450_p13)
}
  0x2e   : > { %336 = dma.vmem_to_hbm [thread:$0]  (%p576_p9), %s221_s29, 32, %s223_s30, %s206_s12  }
  0x2f PF: > { %s234_s7 = sand.u32 1, %s488_s9   ;;  %p343_p0 = pnand %p324_p12, %p583_p11 }
  0x30   : > { %s235_s16 = scalar_lea.sflag [#allocation4], %s234_s7 }
  0x31   : > { %p344_p1 = pneg %p343_p0 }
  0x33   : > { %483 = dma.done.wait (%p344_p1), %s235_s16, 32  }
  0x34   : > { %485 = vsyncadd (%p344_p1), %s235_s16, 4294967264  ;;  %s18_s14 = sadd.s32 1, %s508_s14   ;;  %s655_s9 = smov %s492_s10 }
  0x35   : > { %p15_p2 = scmp.ge.s32.totalorder %s18_s14, 4   ;;  %s656_s10 = smov %s496_s11 }
  0x36   : > { %s657_s11 = smov %s581_s23  ;;  %s658_s12 = smov %s504_s13 }
  0x37   : > { %s659_s13 = smov %s661_s17  ;;  %17 = sbr.rel (!%p15_p2) target bundleno = 6 (0x6), region = 76 }
  0x3c   :  { %241 = vsyncpa [#allocation3], 1 }
  0x3d   :  { %243 = vsyncpa [#allocation3 + $0x1], 1 }
  0x3e   :  { %244 = vsyncpa [#allocation4], 1 }
  0x3f   :  { %246 = vsyncpa [#allocation4 + $0x1], 1 }

</bundles_post_ra>
